<compile_context>
chip_gen: v7x
topology: tpu7x:2x2x1
jax: 0.10.0
libtpu: 0.0.40
codegen_flags: <defaults>
</compile_context>

<pallas_src>
import functools

import jax
import jax.numpy as jnp
from jax import lax
from jax.experimental import pallas as pl
from jax.experimental.pallas import tpu as pltpu


def _round_up(x, m):
    return pl.cdiv(x, m) * m


def _linkpred_kernel(num_layers, *refs):
    """One batch tile: sigmoid(MLP(concat(u, v))) stored as a lane-dense row.

    refs layout:
      uv_ref  [TB, Kp]   compute dtype (concat(u, v), feature-padded)
      w0_ref  [Kp, Hp]   compute dtype,  b0_ref [1, Hp] f32
      (w_ref [Hp, Hp] compute dtype, b_ref [1, Hp] f32) * (num_layers - 1)
      wo_ref  [So, Hp]   compute dtype (row 0 = real output weights)
      bo_ref  [1, 1]     f32
      out_ref [1, TB]    f32
    """
    uv_ref = refs[0]
    w0_ref, b0_ref = refs[1], refs[2]
    hidden_refs = refs[3:3 + 2 * (num_layers - 1)]
    wo_ref = refs[3 + 2 * (num_layers - 1)]
    bo_ref = refs[4 + 2 * (num_layers - 1)]
    out_ref = refs[5 + 2 * (num_layers - 1)]

    # Layer 0 (fused): concat([u, v], 1) @ W0 + b0 -> single MXU matmul.
    h = jnp.dot(uv_ref[...], w0_ref[...],
                preferred_element_type=jnp.float32) + b0_ref[...]
    h = jnp.maximum(h, 0.0)

    # Remaining hidden layers (low-precision matmul, f32 accumulate/bias/ReLU).
    for l in range(num_layers - 1):
        w_ref = hidden_refs[2 * l]
        b_ref = hidden_refs[2 * l + 1]
        h = jnp.dot(h.astype(w_ref.dtype), w_ref[...],
                    preferred_element_type=jnp.float32) + b_ref[...]
        h = jnp.maximum(h, 0.0)

    # Output layer as wo @ h^T -> [So, TB]; row 0 holds the logits so the
    # store is a lane-dense [1, TB] row. Matmul in compute dtype (single MXU
    # pass), bias add + sigmoid in f32.
    logits_all = lax.dot_general(
        wo_ref[...], h.astype(wo_ref.dtype), (((1,), (1,)), ((), ())),
        preferred_element_type=jnp.float32)            # [So, TB]
    out_ref[...] = jax.nn.sigmoid(logits_all[0:1, :] + bo_ref[...])


def _vmem_capacity_bytes():
    try:
        info = pltpu.get_tpu_info()
        cap = getattr(info, "vmem_capacity_bytes", None)
        if cap:
            return int(cap)
    except Exception:
        pass
    return 64 << 20          # conservative: v7x per-TensorCore VMEM


def _pick_batch_tile(B):
    B128 = int(_round_up(B, 128))
    if B128 <= 256:
        return B128                                    # single small tile
    if B128 <= 2048:
        # >= 2 balanced tiles so both v7x TensorCores get work; the one extra
        # grid step (~0.35 us) is negligible on single-TC chips.
        return int(_round_up(pl.cdiv(B128, 2), 128))
    return 1024                                        # amortize per-step cost


def link_predictor_forward(u_emb, v_emb, params, num_layers,
                           *, compute_dtype=jnp.bfloat16, batch_tile=None):
    """params = (w0, b0, [wi, bi]*(num_layers-1), wo, bo).

    Weights are stored transposed vs. torch: w* are [in, out] (w0 is [2H, H]),
    biases are [1, out], wo is [H, 1], bo is [1, 1]; all f32.  The wrapper
    zero-pads the hidden width to a multiple of 128 and the fused input width
    to the compute dtype's sublane pack (exact: padded weights/biases are zero
    so padded columns stay zero through ReLU), and casts matmul operands to
    `compute_dtype` (pass jnp.float32 for a full-precision, ~3x slower MXU
    path).
    """
    B, H = u_emb.shape
    K = 2 * H
    f32 = jnp.float32
    itemsize = jnp.dtype(compute_dtype).itemsize
    sub = 8 * (4 // itemsize)                 # sublane pack: 8 f32 / 16 bf16
    Hp = int(_round_up(H, 128))               # lane-pad hidden width
    Kp = int(_round_up(K, sub))               # fused input width, sublane-aligned

    if batch_tile is None:
        TB = _pick_batch_tile(B)
    else:
        TB = int(_round_up(max(int(batch_tile), 1), 128))
    B_pad = int(_round_up(B, TB))
    num_tiles = B_pad // TB

    # ---- pad / cast parameters -------------------------------------------
    w0, b0 = params[0], params[1]
    w0_p = jnp.pad(w0.astype(f32), ((0, Kp - K), (0, Hp - H))).astype(compute_dtype)
    b0_p = jnp.pad(b0.astype(f32).reshape(1, H), ((0, 0), (0, Hp - H)))

    hidden = []
    idx = 2
    for _ in range(num_layers - 1):
        w, b = params[idx], params[idx + 1]
        idx += 2
        w_p = jnp.pad(w.astype(f32), ((0, Hp - H), (0, Hp - H))).astype(compute_dtype)
        b_p = jnp.pad(b.astype(f32).reshape(1, H), ((0, 0), (0, Hp - H)))
        hidden += [w_p, b_p]

    wo, bo = params[idx], params[idx + 1]
    # wo as an [So, Hp] block (row 0 real, rest zero): So = sublane pack of the
    # compute dtype so the MXU LHS tile is unmasked.
    wo_p = jnp.pad(wo.astype(f32).reshape(1, H),
                   ((0, sub - 1), (0, Hp - H))).astype(compute_dtype)
    bo_p = bo.astype(f32).reshape(1, 1)

    # ---- fused, padded activation stream (padded rows sliced off at end) ---
    uv = jnp.concatenate([u_emb, v_emb], axis=1).astype(f32)
    uv_p = jnp.pad(uv, ((0, B_pad - B), (0, Kp - K))).astype(compute_dtype)

    inputs = (uv_p, w0_p, b0_p, *hidden, wo_p, bo_p)

    def make_in_specs(weight_mode):
        specs = [pl.BlockSpec((TB, Kp), lambda i: (i, 0))]   # streamed per tile
        for x in inputs[1:]:                                 # VMEM-resident params
            if weight_mode is None:
                specs.append(pl.BlockSpec(x.shape, lambda i: (0, 0)))
            else:
                specs.append(pl.BlockSpec(x.shape, lambda i: (0, 0),
                                          pipeline_mode=weight_mode))
        return specs

    out_specs = pl.BlockSpec((1, TB), lambda i: (i, 0))      # lane-dense row

    # ---- scheduler / VMEM hints --------------------------------------------
    weight_bytes = int(sum(x.size * x.dtype.itemsize for x in inputs[1:]))
    flops = int(2 * B_pad * (Kp * Hp + (num_layers - 1) * Hp * Hp + Hp))
    bytes_accessed = int(B_pad * Kp * itemsize + weight_bytes + B_pad * 4)
    cost = pl.CostEstimate(flops=flops, transcendentals=int(B_pad),
                           bytes_accessed=bytes_accessed)

    vmem_est = (2 * TB * Kp * itemsize          # uv tile, double-buffered
                + weight_bytes                  # resident params (single buffer)
                + 2 * TB * Hp * 4               # f32 activations / MXU results
                + 2 * TB * 4)                   # out row, double-buffered
    vmem_budget = int(0.75 * _vmem_capacity_bytes())
    vmem_limit = int(max(32 << 20, min(2 * vmem_est + (8 << 20), vmem_budget)))
    # TODO(synk): if weight_bytes alone exceeds vmem_budget (very wide/deep
    # MLPs), stream the hidden-layer weights over an extra grid axis instead of
    # keeping them VMEM-resident.

    kernel = functools.partial(_linkpred_kernel, num_layers)

    def run(weight_mode):
        return pl.pallas_call(
            kernel,
            out_shape=jax.ShapeDtypeStruct((num_tiles, TB), jnp.float32),
            grid_spec=pltpu.PrefetchScalarGridSpec(
                num_scalar_prefetch=0,
                grid=(num_tiles,),
                in_specs=make_in_specs(weight_mode),
                out_specs=out_specs,
            ),
            compiler_params=pltpu.CompilerParams(
                dimension_semantics=("parallel",),   # batch tiles independent
                vmem_limit_bytes=vmem_limit),
            cost_estimate=cost,
        )(*inputs)

    try:
        # Single-buffer the grid-invariant weights/biases (halves their VMEM).
        out = run(pl.Buffered(1))
    except Exception:
        # Fallback for jax builds that reject buffer_count=1 on pallas_call.
        out = run(None)

    # torch .squeeze() on [B, 1] -> [B]; drop padded rows.
    return out.reshape(-1)[:B]


def init_params(key, num_layers, hidden_dim):
    """Deterministic init matching the PyTorch module's parameter shapes.

    nn.Linear(in, out) has weight [out, in]; we store the transpose [in, out].
    """
    params = []
    keys = jax.random.split(key, 2 * (num_layers + 1))
    kidx = 0
    in_dim = 2 * hidden_dim
    for _ in range(num_layers):
        bound = 1.0 / float(in_dim) ** 0.5
        w = jax.random.uniform(keys[kidx], (in_dim, hidden_dim),
                               minval=-bound, maxval=bound, dtype=jnp.float32)
        b = jax.random.uniform(keys[kidx + 1], (1, hidden_dim),
                               minval=-bound, maxval=bound, dtype=jnp.float32)
        kidx += 2
        params += [w, b]
        in_dim = hidden_dim
    bound = 1.0 / float(hidden_dim) ** 0.5
    wo = jax.random.uniform(keys[kidx], (hidden_dim, 1),
                            minval=-bound, maxval=bound, dtype=jnp.float32)
    bo = jax.random.uniform(keys[kidx + 1], (1, 1),
                            minval=-bound, maxval=bound, dtype=jnp.float32)
    params += [wo, bo]
    return tuple(params)


def reference_forward(u_emb, v_emb, params, num_layers):
    """Pure-JAX f32 reference identical to the PyTorch forward."""
    h = jnp.concatenate([u_emb, v_emb], axis=1)
    idx = 0
    for _ in range(num_layers):
        w, b = params[idx], params[idx + 1]
        idx += 2
        h = jnp.maximum(h @ w + b, 0.0)
    wo, bo = params[idx], params[idx + 1]
    return jax.nn.sigmoid(h @ wo + bo).reshape(-1)


if __name__ == "__main__":
    num_layers = 2
    hidden_dim = 32
    batch = 8

    key = jax.random.PRNGKey(0)
    k_u, k_v, k_p = jax.random.split(key, 3)
    u_emb = jax.random.normal(k_u, (batch, hidden_dim), dtype=jnp.float32)
    v_emb = jax.random.normal(k_v, (batch, hidden_dim), dtype=jnp.float32)
    params = init_params(k_p, num_layers, hidden_dim)

    ref = reference_forward(u_emb, v_emb, params, num_layers)

    # Default path: bf16 matmuls, f32 accumulation / bias / sigmoid.
    out = jax.block_until_ready(
        link_predictor_forward(u_emb, v_emb, params, num_layers))
    assert out.shape == (batch,)
    assert jnp.allclose(out, ref, atol=2e-2, rtol=2e-2), \
        f"bf16 path mismatch: {jnp.max(jnp.abs(out - ref))}"

    # Full-precision path double-checks tiling / padding / lane-dense store.
    out_f32 = jax.block_until_ready(
        link_predictor_forward(u_emb, v_emb, params, num_layers,
                               compute_dtype=jnp.float32))
    assert jnp.allclose(out_f32, ref, atol=1e-4, rtol=1e-4), \
        f"f32 path mismatch: {jnp.max(jnp.abs(out_f32 - ref))}"

    # num_layers=1 edge case (no hidden-layer loop).
    params1 = init_params(jax.random.PRNGKey(7), 1, hidden_dim)
    ref1 = reference_forward(u_emb, v_emb, params1, 1)
    out1 = jax.block_until_ready(
        link_predictor_forward(u_emb, v_emb, params1, 1))
    assert jnp.allclose(out1, ref1, atol=2e-2, rtol=2e-2), \
        f"1-layer mismatch: {jnp.max(jnp.abs(out1 - ref1))}"

    # Multi-tile grid + ragged batch (B not a multiple of the batch tile).
    batch2 = 300
    u2 = jax.random.normal(jax.random.PRNGKey(1), (batch2, hidden_dim), jnp.float32)
    v2 = jax.random.normal(jax.random.PRNGKey(2), (batch2, hidden_dim), jnp.float32)
    ref2 = reference_forward(u2, v2, params, num_layers)
    out2 = jax.block_until_ready(
        link_predictor_forward(u2, v2, params, num_layers, batch_tile=128))
    assert out2.shape == (batch2,)
    assert jnp.allclose(out2, ref2, atol=2e-2, rtol=2e-2), \
        f"multi-tile mismatch: {jnp.max(jnp.abs(out2 - ref2))}"

    print("KERNEL_OK")
</pallas_src>

<mosaic_0001>
module attributes {stable_mosaic.version = 11 : i64} {
  func.func @_linkpred_kernel(%arg0: i32, %arg1: memref<128x64xbf16, #tpu.memory_space<vmem>>, %arg2: memref<64x128xbf16, #tpu.memory_space<vmem>>, %arg3: memref<1x128xf32, #tpu.memory_space<vmem>>, %arg4: memref<128x128xbf16, #tpu.memory_space<vmem>>, %arg5: memref<1x128xf32, #tpu.memory_space<vmem>>, %arg6: memref<16x128xbf16, #tpu.memory_space<vmem>>, %arg7: memref<1x1xf32, #tpu.memory_space<vmem>>, %arg8: memref<1x128xf32, #tpu.memory_space<vmem>>) attributes {dimension_semantics = [#tpu.dimension_semantics<parallel>], iteration_bounds = array<i64: 1>, scalar_prefetch = 0 : i64, scratch_operands = 0 : i64, tpu.core_type = #tpu.core_type<tc>, window_params = [{transform_indices = @transform_0, window_bounds = array<i64: 128, 64>}, {pipeline_mode = #tpu.pipeline_mode<synchronous>, transform_indices = @transform_1, window_bounds = array<i64: 64, 128>}, {pipeline_mode = #tpu.pipeline_mode<synchronous>, transform_indices = @transform_2, window_bounds = array<i64: 1, 128>}, {pipeline_mode = #tpu.pipeline_mode<synchronous>, transform_indices = @transform_3, window_bounds = array<i64: 128, 128>}, {pipeline_mode = #tpu.pipeline_mode<synchronous>, transform_indices = @transform_4, window_bounds = array<i64: 1, 128>}, {pipeline_mode = #tpu.pipeline_mode<synchronous>, transform_indices = @transform_5, window_bounds = array<i64: 16, 128>}, {pipeline_mode = #tpu.pipeline_mode<synchronous>, transform_indices = @transform_6, window_bounds = array<i64: 1, 1>}, {transform_indices = @transform_7, window_bounds = array<i64: 1, 128>}]} {
    %c0 = arith.constant 0 : index
    %c0_0 = arith.constant 0 : index
    %0 = vector.load %arg1[%c0, %c0_0] : memref<128x64xbf16, #tpu.memory_space<vmem>>, vector<128x64xbf16>
    %c0_1 = arith.constant 0 : index
    %c0_2 = arith.constant 0 : index
    %1 = vector.load %arg2[%c0_1, %c0_2] : memref<64x128xbf16, #tpu.memory_space<vmem>>, vector<64x128xbf16>
    %cst = arith.constant dense<0.000000e+00> : vector<128x128xf32>
    %2 = tpu.matmul %0, %1, %cst {dimension_numbers = #tpu.dot_dimension_numbers<[1], [0], [0], [1], [0, 0, 1, 1], [], []>} : vector<128x64xbf16>, vector<64x128xbf16>, vector<128x128xf32> -> vector<128x128xf32>
    %c0_3 = arith.constant 0 : index
    %c0_4 = arith.constant 0 : index
    %3 = vector.load %arg3[%c0_3, %c0_4] : memref<1x128xf32, #tpu.memory_space<vmem>>, vector<1x128xf32>
    %4 = vector.broadcast %3 : vector<1x128xf32> to vector<128x128xf32>
    %5 = arith.addf %2, %4 : vector<128x128xf32>
    %cst_5 = arith.constant 0.000000e+00 : f32
    %6 = vector.broadcast %cst_5 : f32 to vector<128x128xf32>
    %7 = arith.maximumf %5, %6 : vector<128x128xf32>
    %8 = arith.truncf %7 : vector<128x128xf32> to vector<128x128xbf16>
    %c0_6 = arith.constant 0 : index
    %c0_7 = arith.constant 0 : index
    %9 = vector.load %arg4[%c0_6, %c0_7] : memref<128x128xbf16, #tpu.memory_space<vmem>>, vector<128x128xbf16>
    %cst_8 = arith.constant dense<0.000000e+00> : vector<128x128xf32>
    %10 = tpu.matmul %8, %9, %cst_8 {dimension_numbers = #tpu.dot_dimension_numbers<[1], [0], [0], [1], [0, 0, 1, 1], [], []>} : vector<128x128xbf16>, vector<128x128xbf16>, vector<128x128xf32> -> vector<128x128xf32>
    %c0_9 = arith.constant 0 : index
    %c0_10 = arith.constant 0 : index
    %11 = vector.load %arg5[%c0_9, %c0_10] : memref<1x128xf32, #tpu.memory_space<vmem>>, vector<1x128xf32>
    %12 = vector.broadcast %11 : vector<1x128xf32> to vector<128x128xf32>
    %13 = arith.addf %10, %12 : vector<128x128xf32>
    %cst_11 = arith.constant 0.000000e+00 : f32
    %14 = vector.broadcast %cst_11 : f32 to vector<128x128xf32>
    %15 = arith.maximumf %13, %14 : vector<128x128xf32>
    %c0_12 = arith.constant 0 : index
    %c0_13 = arith.constant 0 : index
    %16 = vector.load %arg6[%c0_12, %c0_13] : memref<16x128xbf16, #tpu.memory_space<vmem>>, vector<16x128xbf16>
    %17 = arith.truncf %15 : vector<128x128xf32> to vector<128x128xbf16>
    %cst_14 = arith.constant dense<0.000000e+00> : vector<16x128xf32>
    %18 = tpu.matmul %16, %17, %cst_14 {dimension_numbers = #tpu.dot_dimension_numbers<[1], [1], [0], [0], [0, 0, 1, 0], [], []>} : vector<16x128xbf16>, vector<128x128xbf16>, vector<16x128xf32> -> vector<16x128xf32>
    %19 = vector.extract_strided_slice %18 {offsets = [0, 0], sizes = [1, 128], strides = [1, 1]} : vector<16x128xf32> to vector<1x128xf32>
    %c0_15 = arith.constant 0 : index
    %c0_16 = arith.constant 0 : index
    %20 = vector.load %arg7[%c0_15, %c0_16] : memref<1x1xf32, #tpu.memory_space<vmem>>, vector<1x1xf32>
    %21 = vector.broadcast %20 : vector<1x1xf32> to vector<1x128xf32>
    %22 = arith.addf %19, %21 : vector<1x128xf32>
    %23 = arith.negf %22 : vector<1x128xf32>
    %24 = math.exp %23 : vector<1x128xf32>
    %cst_17 = arith.constant 1.000000e+00 : f32
    %25 = vector.broadcast %cst_17 : f32 to vector<1x128xf32>
    %26 = arith.addf %25, %24 : vector<1x128xf32>
    %27 = arith.divf %25, %26 : vector<1x128xf32>
    %c0_18 = arith.constant 0 : index
    %c0_19 = arith.constant 0 : index
    %28 = vector.load %arg8[%c0_18, %c0_19] : memref<1x128xf32, #tpu.memory_space<vmem>>, vector<1x128xf32>
    tpu.vector_store %arg8[%c0_18, %c0_19], %27 {strides = array<i32>} : memref<1x128xf32, #tpu.memory_space<vmem>>, vector<1x128xf32>,
    return
  }
  func.func @transform_0(%arg0: i32) -> (i32, i32) {
    %c0_i32 = arith.constant 0 : i32
    %c0_i32_0 = arith.constant 0 : i32
    return %arg0, %c0_i32 : i32, i32
  }
  func.func @transform_1(%arg0: i32) -> (i32, i32) {
    %c0_i32 = arith.constant 0 : i32
    %c0_i32_0 = arith.constant 0 : i32
    %c0_i32_1 = arith.constant 0 : i32
    return %c0_i32, %c0_i32_0 : i32, i32
  }
  func.func @transform_2(%arg0: i32) -> (i32, i32) {
    %c0_i32 = arith.constant 0 : i32
    %c0_i32_0 = arith.constant 0 : i32
    %c0_i32_1 = arith.constant 0 : i32
    return %c0_i32, %c0_i32_0 : i32, i32
  }
  func.func @transform_3(%arg0: i32) -> (i32, i32) {
    %c0_i32 = arith.constant 0 : i32
    %c0_i32_0 = arith.constant 0 : i32
    %c0_i32_1 = arith.constant 0 : i32
    return %c0_i32, %c0_i32_0 : i32, i32
  }
  func.func @transform_4(%arg0: i32) -> (i32, i32) {
    %c0_i32 = arith.constant 0 : i32
    %c0_i32_0 = arith.constant 0 : i32
    %c0_i32_1 = arith.constant 0 : i32
    return %c0_i32, %c0_i32_0 : i32, i32
  }
  func.func @transform_5(%arg0: i32) -> (i32, i32) {
    %c0_i32 = arith.constant 0 : i32
    %c0_i32_0 = arith.constant 0 : i32
    %c0_i32_1 = arith.constant 0 : i32
    return %c0_i32, %c0_i32_0 : i32, i32
  }
  func.func @transform_6(%arg0: i32) -> (i32, i32) {
    %c0_i32 = arith.constant 0 : i32
    %c0_i32_0 = arith.constant 0 : i32
    %c0_i32_1 = arith.constant 0 : i32
    return %c0_i32, %c0_i32_0 : i32, i32
  }
  func.func @transform_7(%arg0: i32) -> (i32, i32) {
    %c0_i32 = arith.constant 0 : i32
    %c0_i32_0 = arith.constant 0 : i32
    return %arg0, %c0_i32 : i32, i32
  }
}

module attributes {stable_mosaic.version = 11 : i64} {
  func.func @_linkpred_kernel(%arg0: i32, %arg1: memref<128x64xbf16, #tpu.memory_space<vmem>>, %arg2: memref<64x128xbf16, #tpu.memory_space<vmem>>, %arg3: memref<1x128xf32, #tpu.memory_space<vmem>>, %arg4: memref<128x128xbf16, #tpu.memory_space<vmem>>, %arg5: memref<1x128xf32, #tpu.memory_space<vmem>>, %arg6: memref<16x128xbf16, #tpu.memory_space<vmem>>, %arg7: memref<1x1xf32, #tpu.memory_space<vmem>>, %arg8: memref<1x128xf32, #tpu.memory_space<vmem>>) attributes {dimension_semantics = [#tpu.dimension_semantics<parallel>], iteration_bounds = array<i64: 1>, scalar_prefetch = 0 : i64, scratch_operands = 0 : i64, tpu.core_type = #tpu.core_type<tc>, window_params = [{transform_indices = @transform_0, window_bounds = array<i64: 128, 64>}, {pipeline_mode = #tpu.pipeline_mode<synchronous>, transform_indices = @transform_1, window_bounds = array<i64: 64, 128>}, {pipeline_mode = #tpu.pipeline_mode<synchronous>, transform_indices = @transform_2, window_bounds = array<i64: 1, 128>}, {pipeline_mode = #tpu.pipeline_mode<synchronous>, transform_indices = @transform_3, window_bounds = array<i64: 128, 128>}, {pipeline_mode = #tpu.pipeline_mode<synchronous>, transform_indices = @transform_4, window_bounds = array<i64: 1, 128>}, {pipeline_mode = #tpu.pipeline_mode<synchronous>, transform_indices = @transform_5, window_bounds = array<i64: 16, 128>}, {pipeline_mode = #tpu.pipeline_mode<synchronous>, transform_indices = @transform_6, window_bounds = array<i64: 1, 1>}, {transform_indices = @transform_7, window_bounds = array<i64: 1, 128>}]} {
    %c0 = arith.constant 0 : index
    %c0_0 = arith.constant 0 : index
    %0 = vector.load %arg1[%c0, %c0_0] : memref<128x64xbf16, #tpu.memory_space<vmem>>, vector<128x64xbf16>
    %c0_1 = arith.constant 0 : index
    %c0_2 = arith.constant 0 : index
    %1 = vector.load %arg2[%c0_1, %c0_2] : memref<64x128xbf16, #tpu.memory_space<vmem>>, vector<64x128xbf16>
    %cst = arith.constant dense<0.000000e+00> : vector<128x128xf32>
    %2 = tpu.matmul %0, %1, %cst {dimension_numbers = #tpu.dot_dimension_numbers<[1], [0], [0], [1], [0, 0, 1, 1], [], []>} : vector<128x64xbf16>, vector<64x128xbf16>, vector<128x128xf32> -> vector<128x128xf32>
    %c0_3 = arith.constant 0 : index
    %c0_4 = arith.constant 0 : index
    %3 = vector.load %arg3[%c0_3, %c0_4] : memref<1x128xf32, #tpu.memory_space<vmem>>, vector<1x128xf32>
    %4 = vector.broadcast %3 : vector<1x128xf32> to vector<128x128xf32>
    %5 = arith.addf %2, %4 : vector<128x128xf32>
    %cst_5 = arith.constant 0.000000e+00 : f32
    %6 = vector.broadcast %cst_5 : f32 to vector<128x128xf32>
    %7 = arith.maximumf %5, %6 : vector<128x128xf32>
    %8 = arith.truncf %7 : vector<128x128xf32> to vector<128x128xbf16>
    %c0_6 = arith.constant 0 : index
    %c0_7 = arith.constant 0 : index
    %9 = vector.load %arg4[%c0_6, %c0_7] : memref<128x128xbf16, #tpu.memory_space<vmem>>, vector<128x128xbf16>
    %cst_8 = arith.constant dense<0.000000e+00> : vector<128x128xf32>
    %10 = tpu.matmul %8, %9, %cst_8 {dimension_numbers = #tpu.dot_dimension_numbers<[1], [0], [0], [1], [0, 0, 1, 1], [], []>} : vector<128x128xbf16>, vector<128x128xbf16>, vector<128x128xf32> -> vector<128x128xf32>
    %c0_9 = arith.constant 0 : index
    %c0_10 = arith.constant 0 : index
    %11 = vector.load %arg5[%c0_9, %c0_10] : memref<1x128xf32, #tpu.memory_space<vmem>>, vector<1x128xf32>
    %12 = vector.broadcast %11 : vector<1x128xf32> to vector<128x128xf32>
    %13 = arith.addf %10, %12 : vector<128x128xf32>
    %cst_11 = arith.constant 0.000000e+00 : f32
    %14 = vector.broadcast %cst_11 : f32 to vector<128x128xf32>
    %15 = arith.maximumf %13, %14 : vector<128x128xf32>
    %c0_12 = arith.constant 0 : index
    %c0_13 = arith.constant 0 : index
    %16 = vector.load %arg6[%c0_12, %c0_13] : memref<16x128xbf16, #tpu.memory_space<vmem>>, vector<16x128xbf16>
    %17 = arith.truncf %15 : vector<128x128xf32> to vector<128x128xbf16>
    %cst_14 = arith.constant dense<0.000000e+00> : vector<16x128xf32>
    %18 = tpu.matmul %16, %17, %cst_14 {dimension_numbers = #tpu.dot_dimension_numbers<[1], [1], [0], [0], [0, 0, 1, 0], [], []>} : vector<16x128xbf16>, vector<128x128xbf16>, vector<16x128xf32> -> vector<16x128xf32>
    %19 = vector.extract_strided_slice %18 {offsets = [0, 0], sizes = [1, 128], strides = [1, 1]} : vector<16x128xf32> to vector<1x128xf32>
    %c0_15 = arith.constant 0 : index
    %c0_16 = arith.constant 0 : index
    %20 = vector.load %arg7[%c0_15, %c0_16] : memref<1x1xf32, #tpu.memory_space<vmem>>, vector<1x1xf32>
    %21 = vector.broadcast %20 : vector<1x1xf32> to vector<1x128xf32>
    %22 = arith.addf %19, %21 : vector<1x128xf32>
    %23 = arith.negf %22 : vector<1x128xf32>
    %24 = math.exp %23 : vector<1x128xf32>
    %cst_17 = arith.constant 1.000000e+00 : f32
    %25 = vector.broadcast %cst_17 : f32 to vector<1x128xf32>
    %26 = arith.addf %25, %24 : vector<1x128xf32>
    %27 = arith.divf %25, %26 : vector<1x128xf32>
    %c0_18 = arith.constant 0 : index
    %c0_19 = arith.constant 0 : index
    %28 = vector.load %arg8[%c0_18, %c0_19] : memref<1x128xf32, #tpu.memory_space<vmem>>, vector<1x128xf32>
    tpu.vector_store %arg8[%c0_18, %c0_19], %27 {strides = array<i32>} : memref<1x128xf32, #tpu.memory_space<vmem>>, vector<1x128xf32>,
    return
  }
  func.func @transform_0(%arg0: i32) -> (i32, i32) {
    %c0_i32 = arith.constant 0 : i32
    %c0_i32_0 = arith.constant 0 : i32
    return %arg0, %c0_i32 : i32, i32
  }
  func.func @transform_1(%arg0: i32) -> (i32, i32) {
    %c0_i32 = arith.constant 0 : i32
    %c0_i32_0 = arith.constant 0 : i32
    %c0_i32_1 = arith.constant 0 : i32
    return %c0_i32, %c0_i32_0 : i32, i32
  }
  func.func @transform_2(%arg0: i32) -> (i32, i32) {
    %c0_i32 = arith.constant 0 : i32
    %c0_i32_0 = arith.constant 0 : i32
    %c0_i32_1 = arith.constant 0 : i32
    return %c0_i32, %c0_i32_0 : i32, i32
  }
  func.func @transform_3(%arg0: i32) -> (i32, i32) {
    %c0_i32 = arith.constant 0 : i32
    %c0_i32_0 = arith.constant 0 : i32
    %c0_i32_1 = arith.constant 0 : i32
    return %c0_i32, %c0_i32_0 : i32, i32
  }
  func.func @transform_4(%arg0: i32) -> (i32, i32) {
    %c0_i32 = arith.constant 0 : i32
    %c0_i32_0 = arith.constant 0 : i32
    %c0_i32_1 = arith.constant 0 : i32
    return %c0_i32, %c0_i32_0 : i32, i32
  }
  func.func @transform_5(%arg0: i32) -> (i32, i32) {
    %c0_i32 = arith.constant 0 : i32
    %c0_i32_0 = arith.constant 0 : i32
    %c0_i32_1 = arith.constant 0 : i32
    return %c0_i32, %c0_i32_0 : i32, i32
  }
  func.func @transform_6(%arg0: i32) -> (i32, i32) {
    %c0_i32 = arith.constant 0 : i32
    %c0_i32_0 = arith.constant 0 : i32
    %c0_i32_1 = arith.constant 0 : i32
    return %c0_i32, %c0_i32_0 : i32, i32
  }
  func.func @transform_7(%arg0: i32) -> (i32, i32) {
    %c0_i32 = arith.constant 0 : i32
    %c0_i32_0 = arith.constant 0 : i32
    return %arg0, %c0_i32 : i32, i32
  }
}

</mosaic_0001>

<bundles_post_ra>
// kernel: tpu_custom_call.1
= control target key start
LH: loop header
LB: loop body
LE: loop exit
PB: predicated region body
PF: predicated region fallthrough
CT: control target
= control target key end

     0   :  { %s887_s0 = inlined_call_operand.vmem [shape: bf16[128,64], index: 0, kind: input, shape index: {}]   ;;  %s888_s1 = inlined_call_operand.vmem [shape: bf16[64,128], index: 1, kind: input, shape index: {}]   ;;  %s889_s2 = inlined_call_operand.vmem [shape: f32[1,128], index: 2, kind: input, shape index: {}]   ;;  %s890_s3 = inlined_call_operand.vmem [shape: bf16[128,128], index: 3, kind: input, shape index: {}]   ;;  %s891_s4 = inlined_call_operand.vmem [shape: f32[1,128], index: 4, kind: input, shape index: {}]   ;;  %s892_s5 = inlined_call_operand.vmem [shape: bf16[16,128], index: 5, kind: input, shape index: {}]   ;;  %s893_s6 = inlined_call_operand.<no memory space> [shape: f32[1,1], index: 6, kind: input, shape index: {}]   ;;  %s894_s7 = inlined_call_operand.hbm [shape: f32[1,128], index: 7, kind: output, shape index: {}]  }
   0x1   :  { %v12_v0 = vstv %s893_s6 }
   0x2   :  { %13 = vst [vmem:[#allocation2] sm:$0x1] %v12_v0 }
   0x3   :  { %v693_v1 = vld [vmem:[%s888_s1] sm:$0xff]   ;;  %v694_v2 = vld [vmem:[%s888_s1 + $0x8] sm:$0xff]   ;;  %v695_v3 = vld [vmem:[%s888_s1 + $0x10] sm:$0xff]   ;;  %vm125_vm0 = vcmask 523264  }
   0x4   :  { %612 = vmatprep.subr.bf16.mxu1 %v693_v1  ;;  %v697_v4 = vld [vmem:[%s887_s0] sm:$0xff]   ;;  %v696_v5 = vld [vmem:[%s888_s1 + $0x18] sm:$0xff]   ;;  %v698_v7 = vld [vmem:[%s887_s0 + $0x8] sm:$0xff]  }
   0x5   :  { %613 = vmatpush3.bf16.msra.mxu1 %v693_v1  ;;  %620 = vmatprep.mubr.msk.bf16.mxu1 %vm125_vm0, %v697_v4  ;;  %v705_v6 = vld [vmem:[%s890_s3] sm:$0xff]   ;;  %v699_v8 = vld [vmem:[%s887_s0 + $0x10] sm:$0xff]   ;;  %v706_v9 = vld [vmem:[%s890_s3 + $0x8] sm:$0xff]  }
   0x6   :  { %614 = vmatprep.subr.bf16.mxu1 %v694_v2  ;;  %v707_v10 = vld [vmem:[%s890_s3 + $0x10] sm:$0xff]  }
   0x9   :  { %615 = vmatpush3.bf16.msra.mxu1 %v694_v2 }
   0xa   :  { %616 = vmatprep.subr.bf16.mxu1 %v695_v3 }
   0xd   :  { %617 = vmatpush3.bf16.msra.mxu1 %v695_v3 }
   0xe   :  { %618 = vmatprep.subr.bf16.mxu1 %v696_v5 }
  0x11   :  { %619 = vmatpush3.bf16.msra.mxu1 %v696_v5 }
  0x12   :  { %636 = vmatprep.subr.bf16.mxu1 %v705_v6 }
  0x14   :  { %621 = vmatmul.mubr.msk.bf16.vlgmr.msra.gmra.mrb[0].mxu1 %vm125_vm0, %v698_v7 }
  0x15   :  { %624 = vmatprep.mubr.msk.bf16.mxu1 %vm125_vm0, %v699_v8  ;;  %637 = vmatpush3.bf16.msra.mxu1 %v705_v6 }
  0x16   :  { %638 = vmatprep.subr.bf16.mxu1 %v706_v9 }
  0x17   :  { %14 = vsyncpa [#allocation4], 0  ;;  %v700_v11 = vld [vmem:[%s887_s0 + $0x18] sm:$0xff]   ;;  %v701_v12 = vld [vmem:[%s887_s0 + $0x20] sm:$0xff]   ;;  %vm743_vm1 = vmmov 0   ;;  %s745_s19 = smov [#allocation3]  }
  0x18   :  { %v708_v13 = vld [vmem:[%s890_s3 + $0x18] sm:$0xff]   ;;  %v709_v14 = vld [vmem:[%s890_s3 + $0x20] sm:$0xff]   ;;  %v702_v15 = vld [vmem:[%s887_s0 + $0x28] sm:$0xff]   ;;  %s535_s1 = sshll.u32 %s745_s19, 4  ;;  %s536_s1 = int_to_ptr.vmem [resolvable:$true] %s535_s1 }
  0x19   :  { %639 = vmatpush3.bf16.msra.mxu1 %v706_v9  ;;  %v703_v16 = vld [vmem:[%s887_s0 + $0x30] sm:$0xff]   ;;  %v710_v17 = vld [vmem:[%s890_s3 + $0x28] sm:$0xff]   ;;  %v704_v18 = vld [vmem:[%s887_s0 + $0x38] sm:$0xff]   ;;  %s722_s20 = scalar_lea.vmem %s536_s1, 32  ;;  %p723_p1 = scmp.lt.s32.totalorder %s536_s1, %s536_s1 }
  0x1a   :  { %640 = vmatprep.subr.bf16.mxu1 %v707_v10  ;;  %v711_v19 = vld [vmem:[%s890_s3 + $0x30] sm:$0xff]   ;;  %v712_v20 = vld [vmem:[%s890_s3 + $0x38] sm:$0xff]   ;;  %v543_v21 = vld [vmem:[%s889_s2] ss:$0 sm:$0xff] }
  0x1c   :  { %625 = vmatmul.mubr.msk.bf16.gmra.mrb[4].mxu1 %vm125_vm0, %v700_v11 }
  0x1d   :  { %628 = vmatprep.mubr.msk.bf16.mxu1 %vm125_vm0, %v701_v12  ;;  %641 = vmatpush3.bf16.msra.mxu1 %v707_v10 }
  0x1e   :  { %642 = vmatprep.subr.bf16.mxu1 %v708_v13 }
  0x21   :  { %643 = vmatpush3.bf16.msra.mxu1 %v708_v13 }
  0x22   :  { %644 = vmatprep.subr.bf16.mxu1 %v709_v14 }
  0x24   :  { %629 = vmatmul.mubr.msk.bf16.gmra.mrb[8].mxu1 %vm125_vm0, %v702_v15  ;;  %v511_v15 = vld [vmem:[#allocation2] sm:$0x1] }
  0x25   :  { %632 = vmatprep.mubr.msk.bf16.mxu1 %vm125_vm0, %v703_v16  ;;  %645 = vmatpush3.bf16.msra.mxu1 %v709_v14  ;;  %v742_v14 = vmov 0.0   ;;  %v744_v16 = vmov 0  }
  0x26   :  { %646 = vmatprep.subr.bf16.mxu1 %v710_v17  ;;  %668 = vmatprep.subr.bf16.mxu0 %v742_v14 }
  0x27   :  { %684 = vmatprep.mubr.msk.bf16.mxu0 %vm743_vm1, %v742_v14  ;;  %692 = vset.pattern.permute.xlu0 %v744_v16 }
  0x28   :  { %514 = vperm.xlu0 %692, %v511_v15  }
  0x29   :  { %647 = vmatpush3.bf16.msra.mxu1 %v710_v17  ;;  %v564_v17 = vld [vmem:[%s891_s4] ss:$0 sm:$0xff] }
  0x2a   :  { %648 = vmatprep.subr.bf16.mxu1 %v711_v19 }
  0x2c   :  { %633 = vmatmul.mubr.msk.bf16.gmra.mrb[12].mxu1 %vm125_vm0, %v704_v18 }
  0x2d   :  { %649 = vmatpush3.bf16.msra.mxu1 %v711_v19 }
  0x2e   :  { %650 = vmatprep.subr.bf16.mxu1 %v712_v20 }
  0x31   :  { %651 = vmatpush3.bf16.msra.mxu1 %v712_v20 }
  0xa7   :  { %v515_v15 = vpop.permute.xlu0 %514 }
  0xe7   :  { %v622_v22 = vpop.f32.mrb[0].mxu1 }
  0xe8   :  { %v193_v23 = vadd.f32 %v622_v22, %v543_v21  ;;  %v184_v24 = vpop.f32.mrb[1].mxu1 }
  0xe9   :  { %v185_v25 = vadd.f32 %v543_v21, %v184_v24  ;;  %v623_v26 = vpop.f32.mrb[2].mxu1 }
  0xea   :  { %v196_v27 = vadd.f32 %v623_v26, %v543_v21  ;;  %v187_v28 = vpop.f32.mrb[3].mxu1  ;;  %v249_v30 = vmax.f32 %v193_v23, 0.0 }
  0xeb   :  { %v188_v29 = vadd.f32 %v543_v21, %v187_v28  ;;  %v247_v32 = vmax.f32 %v185_v25, 0.0 }
  0xec   :  { %v250_v31 = vmax.f32 %v196_v27, 0.0 }
  0xed   :  { %v248_v33 = vmax.f32 %v188_v29, 0.0 }
  0xee   :  { %v264_v34 = vpack.c.bf16 %v250_v31, %v249_v30 }
  0xef   :  { %v263_v35 = vpack.c.bf16 %v248_v33, %v247_v32  ;;  %v626_v36 = vpop.f32.mrb[4].mxu1 }
  0xf0   :  { %v209_v37 = vadd.f32 %v626_v36, %v543_v21  ;;  %v200_v38 = vpop.f32.mrb[5].mxu1 }
  0xf1   :  { %v201_v39 = vadd.f32 %v543_v21, %v200_v38  ;;  %652 = vmatprep.mubr.bf16.mxu1 %v263_v35  ;;  %v627_v40 = vpop.f32.mrb[6].mxu1 }
  0xf2   :  { %v253_v41 = vmax.f32 %v209_v37, 0.0  ;;  %v212_v42 = vadd.f32 %v627_v40, %v543_v21  ;;  %653 = vmatmul.mubr.bf16.vlgmr.msra.gmra.mrb[16].mxu1 %v264_v34  ;;  %v203_v43 = vpop.f32.mrb[7].mxu1 }
  0xf3   :  { %v251_v44 = vmax.f32 %v201_v39, 0.0  ;;  %v204_v45 = vadd.f32 %v543_v21, %v203_v43 }
  0xf4   :  { %v254_v46 = vmax.f32 %v212_v42, 0.0 }
  0xf5   :  { %v252_v47 = vmax.f32 %v204_v45, 0.0 }
  0xf6   :  { %v266_v48 = vpack.c.bf16 %v254_v46, %v253_v41 }
  0xf7   :  { %v265_v49 = vpack.c.bf16 %v252_v47, %v251_v44  ;;  %v630_v50 = vpop.f32.mrb[8].mxu1 }
  0xf8   :  { %v225_v51 = vadd.f32 %v630_v50, %v543_v21  ;;  %v216_v52 = vpop.f32.mrb[9].mxu1 }
  0xf9   :  { %656 = vmatprep.mubr.bf16.mxu1 %v265_v49  ;;  %v217_v53 = vadd.f32 %v543_v21, %v216_v52  ;;  %v631_v54 = vpop.f32.mrb[10].mxu1 }
  0xfa   :  { %657 = vmatmul.mubr.bf16.gmra.mrb[20].mxu1 %v266_v48  ;;  %v257_v55 = vmax.f32 %v225_v51, 0.0  ;;  %v228_v56 = vadd.f32 %v631_v54, %v543_v21  ;;  %v219_v57 = vpop.f32.mrb[11].mxu1 }
  0xfb   :  { %v255_v58 = vmax.f32 %v217_v53, 0.0  ;;  %v220_v59 = vadd.f32 %v543_v21, %v219_v57 }
  0xfc   :  { %v258_v60 = vmax.f32 %v228_v56, 0.0 }
  0xfd   :  { %v256_v61 = vmax.f32 %v220_v59, 0.0 }
  0xfe   :  { %v268_v62 = vpack.c.bf16 %v258_v60, %v257_v55 }
  0xff   :  { %v267_v63 = vpack.c.bf16 %v256_v61, %v255_v58  ;;  %v634_v0 = vpop.f32.mrb[12].mxu1 }
 0x100   :  { %v241_v1 = vadd.f32 %v634_v0, %v543_v21  ;;  %v232_v2 = vpop.f32.mrb[13].mxu1 }
 0x101   :  { %660 = vmatprep.mubr.bf16.mxu1 %v267_v63  ;;  %v233_v3 = vadd.f32 %v543_v21, %v232_v2  ;;  %v635_v4 = vpop.f32.mrb[14].mxu1 }
 0x102   :  { %661 = vmatmul.mubr.bf16.gmra.mrb[24].mxu1 %v268_v62  ;;  %v261_v5 = vmax.f32 %v241_v1, 0.0  ;;  %v244_v6 = vadd.f32 %v635_v4, %v543_v21  ;;  %v235_v7 = vpop.f32.mrb[15].mxu1 }
 0x103   :  { %v259_v8 = vmax.f32 %v233_v3, 0.0  ;;  %v236_v9 = vadd.f32 %v543_v21, %v235_v7 }
 0x104   :  { %v262_v10 = vmax.f32 %v244_v6, 0.0 }
 0x105   :  { %v260_v11 = vmax.f32 %v236_v9, 0.0 }
 0x106   :  { %v270_v12 = vpack.c.bf16 %v262_v10, %v261_v5  ;;  %v713_v10 = vld [vmem:[%s892_s5] sm:$0xff]   ;;  %s718_s5 = scalar_lea.vmem %s536_s1, 16 }
 0x107   :  { %v269_v13 = vpack.c.bf16 %v260_v11, %v259_v8  ;;  %v517_v11 = vlaneseq  ;;  %p719_p0 = scmp.ne.s32.totalorder %s536_s1, %s718_s5  ;;  %p724_p2 = scmp.lt.s32.totalorder %s722_s20, %s718_s5 }
 0x109   :  { %664 = vmatprep.mubr.bf16.mxu1 %v269_v13  ;;  %p725_p3 = por %p724_p2, %p723_p1 }
 0x10a   :  { %665 = vmatmul.mubr.bf16.gmra.mrb[28].mxu1 %v270_v12  ;;  %v518_v12 = vshrl.u32 %v517_v11, 7 }
 0x10b   :  { %p726_p4 = pnand %p725_p3, %p719_p0 }
 0x10c   :  { %v519_v13 = vsub.s32 0, %v518_v12 }
 0x10e   :  { %v520_v16 = vrot.slane %v515_v15, %v519_v13 }
 0x1c5   :  { %v654_v18 = vpop.f32.mrb[16].mxu1 }
 0x1c6   :  { %v385_v19 = vadd.f32 %v654_v18, %v564_v17  ;;  %v376_v20 = vpop.f32.mrb[17].mxu1 }
 0x1c7   :  { %v377_v21 = vadd.f32 %v564_v17, %v376_v20  ;;  %v655_v22 = vpop.f32.mrb[18].mxu1 }
 0x1c8   :  { %v388_v23 = vadd.f32 %v655_v22, %v564_v17  ;;  %v379_v24 = vpop.f32.mrb[19].mxu1  ;;  %v441_v26 = vmax.f32 %v385_v19, 0.0 }
 0x1c9   :  { %v380_v25 = vadd.f32 %v564_v17, %v379_v24  ;;  %v439_v28 = vmax.f32 %v377_v21, 0.0 }
 0x1ca   :  { %v442_v27 = vmax.f32 %v388_v23, 0.0 }
 0x1cb   :  { %v440_v29 = vmax.f32 %v380_v25, 0.0 }
 0x1cc   :  { %v458_v30 = vpack.c.bf16 %v442_v27, %v441_v26 }
 0x1cd   :  { %v658_v31 = vpop.f32.mrb[20].mxu1  ;;  %v457_v32 = vpack.c.bf16 %v440_v29, %v439_v28 }
 0x1ce   :  { %v401_v33 = vadd.f32 %v658_v31, %v564_v17  ;;  %v392_v34 = vpop.f32.mrb[21].mxu1 }
 0x1cf   :  { %v393_v35 = vadd.f32 %v564_v17, %v392_v34  ;;  %669 = vmatpush3.bf16.xpose.msra.mxu0 %v457_v32  ;;  %v659_v36 = vpop.f32.mrb[22].mxu1 }
 0x1d0   :  { %v445_v37 = vmax.f32 %v401_v33, 0.0  ;;  %v404_v38 = vadd.f32 %v659_v36, %v564_v17  ;;  %v395_v39 = vpop.f32.mrb[23].mxu1  ;;  %670 = vmatprep.subr.bf16.mxu0 %v742_v14 }
 0x1d1   :  { %v443_v40 = vmax.f32 %v393_v35, 0.0  ;;  %v396_v41 = vadd.f32 %v564_v17, %v395_v39 }
 0x1d2   :  { %v446_v42 = vmax.f32 %v404_v38, 0.0 }
 0x1d3   :  { %v444_v43 = vmax.f32 %v396_v41, 0.0 }
 0x1d4   :  { %v460_v44 = vpack.c.bf16 %v446_v42, %v445_v37 }
 0x1d5   :  { %v459_v45 = vpack.c.bf16 %v444_v43, %v443_v40  ;;  %v662_v46 = vpop.f32.mrb[24].mxu1 }
 0x1d6   :  { %v417_v47 = vadd.f32 %v662_v46, %v564_v17  ;;  %v408_v48 = vpop.f32.mrb[25].mxu1 }
 0x1d7   :  { %671 = vmatpush3.bf16.xpose.msra.mxu0 %v458_v30  ;;  %v409_v49 = vadd.f32 %v564_v17, %v408_v48  ;;  %v663_v50 = vpop.f32.mrb[26].mxu1 }
 0x1d8   :  { %v449_v51 = vmax.f32 %v417_v47, 0.0  ;;  %672 = vmatprep.subr.bf16.mxu0 %v742_v14  ;;  %v420_v52 = vadd.f32 %v663_v50, %v564_v17  ;;  %v411_v53 = vpop.f32.mrb[27].mxu1 }
 0x1d9   :  { %v447_v54 = vmax.f32 %v409_v49, 0.0  ;;  %v412_v55 = vadd.f32 %v564_v17, %v411_v53 }
 0x1da   :  { %v450_v56 = vmax.f32 %v420_v52, 0.0 }
 0x1db   :  { %v448_v57 = vmax.f32 %v412_v55, 0.0 }
 0x1dc   :  { %v462_v58 = vpack.c.bf16 %v450_v56, %v449_v51 }
 0x1dd   :  { %v461_v59 = vpack.c.bf16 %v448_v57, %v447_v54  ;;  %v666_v60 = vpop.f32.mrb[28].mxu1 }
 0x1de   :  { %v433_v61 = vadd.f32 %v666_v60, %v564_v17  ;;  %v424_v62 = vpop.f32.mrb[29].mxu1 }
 0x1df   :  { %673 = vmatpush3.bf16.xpose.msra.mxu0 %v459_v45  ;;  %v425_v63 = vadd.f32 %v564_v17, %v424_v62  ;;  %v667_v0 = vpop.f32.mrb[30].mxu1 }
 0x1e0   :  { %674 = vmatprep.subr.bf16.mxu0 %v742_v14  ;;  %v453_v1 = vmax.f32 %v433_v61, 0.0  ;;  %v436_v2 = vadd.f32 %v667_v0, %v564_v17  ;;  %v427_v3 = vpop.f32.mrb[31].mxu1 }
 0x1e1   :  { %v451_v4 = vmax.f32 %v425_v63, 0.0  ;;  %v428_v5 = vadd.f32 %v564_v17, %v427_v3 }
 0x1e2   :  { %v454_v6 = vmax.f32 %v436_v2, 0.0 }
 0x1e3   :  { %v452_v7 = vmax.f32 %v428_v5, 0.0 }
 0x1e4   :  { %v464_v8 = vpack.c.bf16 %v454_v6, %v453_v1 }
 0x1e5   :  { %v463_v9 = vpack.c.bf16 %v452_v7, %v451_v4 }
 0x1e7   :  { %675 = vmatpush3.bf16.xpose.msra.mxu0 %v460_v44 }
 0x1e8   :  { %676 = vmatprep.subr.bf16.mxu0 %v742_v14 }
 0x1ef   :  { %677 = vmatpush3.bf16.xpose.msra.mxu0 %v461_v59 }
 0x1f0   :  { %678 = vmatprep.subr.bf16.mxu0 %v742_v14 }
 0x1f7   :  { %679 = vmatpush3.bf16.xpose.msra.mxu0 %v462_v58 }
 0x1f8   :  { %680 = vmatprep.subr.bf16.mxu0 %v742_v14 }
 0x1ff   :  { %681 = vmatpush3.bf16.xpose.msra.mxu0 %v463_v9 }
 0x200   :  { %682 = vmatprep.subr.bf16.mxu0 %v742_v14 }
 0x207   :  { %683 = vmatpush3.bf16.xpose.msra.mxu0 %v464_v8 }
 0x20e   :  { %685 = vmatmul.mubr.bf16.vlgmr.msra.gmra.mrb[0].mxu0 %v713_v10 }
 0x2e1   :  { %v505_v17 = vpop.f32.mrb[0].mxu0 }
 0x2e2   :  { %v521_v18 = vadd.f32 %v520_v16, %v505_v17  ;;  %v686_v19 = vpop.f32.mrb[1].mxu0 }
 0x2e3   :  { %v508_v20 = vpop.f32.mrb[2].mxu0 }
 0x2e4   :  { %v574_v21 = vmul.f32 -1.442695, %v521_v18  ;;  %v687_v22 = vpop.f32.mrb[3].mxu0 }
 0x2e6   :  { %714 = vpow2.f32 %v574_v21 }
 0x2f0   :  { %v715_v23 = vpop.eup %714 }
 0x2f1   :  { %v525_v14 = vadd.f32 1.0, %v715_v23 }
 0x2f3   :  { %716 = vrcp.f32 %v525_v14 }
 0x2fd   :  { %v717_v24 = vpop.eup %716 }
 0x2fe   :  { %528 = vst [vmem:[#allocation3] sm:$0x1] %v717_v24 }
 0x2ff   :  { %729 = shalt.err (!%p726_p4)
}
 0x300   :  { %s730_s23 = scalar_lea.hbm %s894_s7, 16 }
 0x301   :  { %p731_p5 = scmp.ne.s32.totalorder %s894_s7, %s730_s23  ;;  %p734_p6 = scmp.lt.u32.totalorder %s730_s23, %s894_s7 }
 0x303   :  { %p736_p7 = pnand %p734_p6, %p731_p5 }
 0x305   :  { %739 = shalt.err (!%p736_p7)
}
 0x306   :  { %538 = dma.vmem_to_hbm [thread:$0]  %s536_s1, 16, %s894_s7, [#allocation4]  }
 0x307   :  { %740 = dma.done.wait [#allocation4], 16  }
 0x308   :  { %741 = vsyncadd [#allocation4], 4294967280 }
 0x309   :  { %542 = vsyncpa [#allocation4], 1 }

// kernel: tpu_custom_call.1
= control target key start
LH: loop header
LB: loop body
LE: loop exit
PB: predicated region body
PF: predicated region fallthrough
CT: control target
= control target key end

     0   :  { %s887_s0 = inlined_call_operand.vmem [shape: bf16[128,64], index: 0, kind: input, shape index: {}]   ;;  %s888_s1 = inlined_call_operand.vmem [shape: bf16[64,128], index: 1, kind: input, shape index: {}]   ;;  %s889_s2 = inlined_call_operand.vmem [shape: f32[1,128], index: 2, kind: input, shape index: {}]   ;;  %s890_s3 = inlined_call_operand.vmem [shape: bf16[128,128], index: 3, kind: input, shape index: {}]   ;;  %s891_s4 = inlined_call_operand.vmem [shape: f32[1,128], index: 4, kind: input, shape index: {}]   ;;  %s892_s5 = inlined_call_operand.vmem [shape: bf16[16,128], index: 5, kind: input, shape index: {}]   ;;  %s893_s6 = inlined_call_operand.<no memory space> [shape: f32[1,1], index: 6, kind: input, shape index: {}]   ;;  %s894_s7 = inlined_call_operand.hbm [shape: f32[1,128], index: 7, kind: output, shape index: {}]  }
   0x1   :  { %v12_v0 = vstv %s893_s6 }
   0x2   :  { %13 = vst [vmem:[#allocation2] sm:$0x1] %v12_v0 }
   0x3   :  { %v693_v1 = vld [vmem:[%s888_s1] sm:$0xff]   ;;  %v694_v2 = vld [vmem:[%s888_s1 + $0x8] sm:$0xff]   ;;  %v695_v3 = vld [vmem:[%s888_s1 + $0x10] sm:$0xff]   ;;  %vm125_vm0 = vcmask 523264  }
   0x4   :  { %612 = vmatprep.subr.bf16.mxu1 %v693_v1  ;;  %v697_v4 = vld [vmem:[%s887_s0] sm:$0xff]   ;;  %v696_v5 = vld [vmem:[%s888_s1 + $0x18] sm:$0xff]   ;;  %v698_v7 = vld [vmem:[%s887_s0 + $0x8] sm:$0xff]  }
   0x5   :  { %613 = vmatpush3.bf16.msra.mxu1 %v693_v1  ;;  %620 = vmatprep.mubr.msk.bf16.mxu1 %vm125_vm0, %v697_v4  ;;  %v705_v6 = vld [vmem:[%s890_s3] sm:$0xff]   ;;  %v699_v8 = vld [vmem:[%s887_s0 + $0x10] sm:$0xff]   ;;  %v706_v9 = vld [vmem:[%s890_s3 + $0x8] sm:$0xff]  }
   0x6   :  { %614 = vmatprep.subr.bf16.mxu1 %v694_v2  ;;  %v707_v10 = vld [vmem:[%s890_s3 + $0x10] sm:$0xff]  }
   0x9   :  { %615 = vmatpush3.bf16.msra.mxu1 %v694_v2 }
   0xa   :  { %616 = vmatprep.subr.bf16.mxu1 %v695_v3 }
   0xd   :  { %617 = vmatpush3.bf16.msra.mxu1 %v695_v3 }
   0xe   :  { %618 = vmatprep.subr.bf16.mxu1 %v696_v5 }
  0x11   :  { %619 = vmatpush3.bf16.msra.mxu1 %v696_v5 }
  0x12   :  { %636 = vmatprep.subr.bf16.mxu1 %v705_v6 }
  0x14   :  { %621 = vmatmul.mubr.msk.bf16.vlgmr.msra.gmra.mrb[0].mxu1 %vm125_vm0, %v698_v7 }
  0x15   :  { %624 = vmatprep.mubr.msk.bf16.mxu1 %vm125_vm0, %v699_v8  ;;  %637 = vmatpush3.bf16.msra.mxu1 %v705_v6 }
  0x16   :  { %638 = vmatprep.subr.bf16.mxu1 %v706_v9 }
  0x17   :  { %14 = vsyncpa [#allocation4], 0  ;;  %v700_v11 = vld [vmem:[%s887_s0 + $0x18] sm:$0xff]   ;;  %v701_v12 = vld [vmem:[%s887_s0 + $0x20] sm:$0xff]   ;;  %vm743_vm1 = vmmov 0   ;;  %s745_s19 = smov [#allocation3]  }
  0x18   :  { %v708_v13 = vld [vmem:[%s890_s3 + $0x18] sm:$0xff]   ;;  %v709_v14 = vld [vmem:[%s890_s3 + $0x20] sm:$0xff]   ;;  %v702_v15 = vld [vmem:[%s887_s0 + $0x28] sm:$0xff]   ;;  %s535_s1 = sshll.u32 %s745_s19, 4  ;;  %s536_s1 = int_to_ptr.vmem [resolvable:$true] %s535_s1 }
  0x19   :  { %639 = vmatpush3.bf16.msra.mxu1 %v706_v9  ;;  %v703_v16 = vld [vmem:[%s887_s0 + $0x30] sm:$0xff]   ;;  %v710_v17 = vld [vmem:[%s890_s3 + $0x28] sm:$0xff]   ;;  %v704_v18 = vld [vmem:[%s887_s0 + $0x38] sm:$0xff]   ;;  %s722_s20 = scalar_lea.vmem %s536_s1, 32  ;;  %p723_p1 = scmp.lt.s32.totalorder %s536_s1, %s536_s1 }
  0x1a   :  { %640 = vmatprep.subr.bf16.mxu1 %v707_v10  ;;  %v711_v19 = vld [vmem:[%s890_s3 + $0x30] sm:$0xff]   ;;  %v712_v20 = vld [vmem:[%s890_s3 + $0x38] sm:$0xff]   ;;  %v543_v21 = vld [vmem:[%s889_s2] ss:$0 sm:$0xff] }
  0x1c   :  { %625 = vmatmul.mubr.msk.bf16.gmra.mrb[4].mxu1 %vm125_vm0, %v700_v11 }
  0x1d   :  { %628 = vmatprep.mubr.msk.bf16.mxu1 %vm125_vm0, %v701_v12  ;;  %641 = vmatpush3.bf16.msra.mxu1 %v707_v10 }
  0x1e   :  { %642 = vmatprep.subr.bf16.mxu1 %v708_v13 }
  0x21   :  { %643 = vmatpush3.bf16.msra.mxu1 %v708_v13 }
  0x22   :  { %644 = vmatprep.subr.bf16.mxu1 %v709_v14 }
  0x24   :  { %629 = vmatmul.mubr.msk.bf16.gmra.mrb[8].mxu1 %vm125_vm0, %v702_v15  ;;  %v511_v15 = vld [vmem:[#allocation2] sm:$0x1] }
  0x25   :  { %632 = vmatprep.mubr.msk.bf16.mxu1 %vm125_vm0, %v703_v16  ;;  %645 = vmatpush3.bf16.msra.mxu1 %v709_v14  ;;  %v742_v14 = vmov 0.0   ;;  %v744_v16 = vmov 0  }
  0x26   :  { %646 = vmatprep.subr.bf16.mxu1 %v710_v17  ;;  %668 = vmatprep.subr.bf16.mxu0 %v742_v14 }
  0x27   :  { %684 = vmatprep.mubr.msk.bf16.mxu0 %vm743_vm1, %v742_v14  ;;  %692 = vset.pattern.permute.xlu0 %v744_v16 }
  0x28   :  { %514 = vperm.xlu0 %692, %v511_v15  }
  0x29   :  { %647 = vmatpush3.bf16.msra.mxu1 %v710_v17  ;;  %v564_v17 = vld [vmem:[%s891_s4] ss:$0 sm:$0xff] }
  0x2a   :  { %648 = vmatprep.subr.bf16.mxu1 %v711_v19 }
  0x2c   :  { %633 = vmatmul.mubr.msk.bf16.gmra.mrb[12].mxu1 %vm125_vm0, %v704_v18 }
  0x2d   :  { %649 = vmatpush3.bf16.msra.mxu1 %v711_v19 }
  0x2e   :  { %650 = vmatprep.subr.bf16.mxu1 %v712_v20 }
  0x31   :  { %651 = vmatpush3.bf16.msra.mxu1 %v712_v20 }
  0xa7   :  { %v515_v15 = vpop.permute.xlu0 %514 }
  0xe7   :  { %v622_v22 = vpop.f32.mrb[0].mxu1 }
  0xe8   :  { %v193_v23 = vadd.f32 %v622_v22, %v543_v21  ;;  %v184_v24 = vpop.f32.mrb[1].mxu1 }
  0xe9   :  { %v185_v25 = vadd.f32 %v543_v21, %v184_v24  ;;  %v623_v26 = vpop.f32.mrb[2].mxu1 }
  0xea   :  { %v196_v27 = vadd.f32 %v623_v26, %v543_v21  ;;  %v187_v28 = vpop.f32.mrb[3].mxu1  ;;  %v249_v30 = vmax.f32 %v193_v23, 0.0 }
  0xeb   :  { %v188_v29 = vadd.f32 %v543_v21, %v187_v28  ;;  %v247_v32 = vmax.f32 %v185_v25, 0.0 }
  0xec   :  { %v250_v31 = vmax.f32 %v196_v27, 0.0 }
  0xed   :  { %v248_v33 = vmax.f32 %v188_v29, 0.0 }
  0xee   :  { %v264_v34 = vpack.c.bf16 %v250_v31, %v249_v30 }
  0xef   :  { %v263_v35 = vpack.c.bf16 %v248_v33, %v247_v32  ;;  %v626_v36 = vpop.f32.mrb[4].mxu1 }
  0xf0   :  { %v209_v37 = vadd.f32 %v626_v36, %v543_v21  ;;  %v200_v38 = vpop.f32.mrb[5].mxu1 }
  0xf1   :  { %v201_v39 = vadd.f32 %v543_v21, %v200_v38  ;;  %652 = vmatprep.mubr.bf16.mxu1 %v263_v35  ;;  %v627_v40 = vpop.f32.mrb[6].mxu1 }
  0xf2   :  { %v253_v41 = vmax.f32 %v209_v37, 0.0  ;;  %v212_v42 = vadd.f32 %v627_v40, %v543_v21  ;;  %653 = vmatmul.mubr.bf16.vlgmr.msra.gmra.mrb[16].mxu1 %v264_v34  ;;  %v203_v43 = vpop.f32.mrb[7].mxu1 }
  0xf3   :  { %v251_v44 = vmax.f32 %v201_v39, 0.0  ;;  %v204_v45 = vadd.f32 %v543_v21, %v203_v43 }
  0xf4   :  { %v254_v46 = vmax.f32 %v212_v42, 0.0 }
  0xf5   :  { %v252_v47 = vmax.f32 %v204_v45, 0.0 }
  0xf6   :  { %v266_v48 = vpack.c.bf16 %v254_v46, %v253_v41 }
  0xf7   :  { %v265_v49 = vpack.c.bf16 %v252_v47, %v251_v44  ;;  %v630_v50 = vpop.f32.mrb[8].mxu1 }
  0xf8   :  { %v225_v51 = vadd.f32 %v630_v50, %v543_v21  ;;  %v216_v52 = vpop.f32.mrb[9].mxu1 }
  0xf9   :  { %656 = vmatprep.mubr.bf16.mxu1 %v265_v49  ;;  %v217_v53 = vadd.f32 %v543_v21, %v216_v52  ;;  %v631_v54 = vpop.f32.mrb[10].mxu1 }
  0xfa   :  { %657 = vmatmul.mubr.bf16.gmra.mrb[20].mxu1 %v266_v48  ;;  %v257_v55 = vmax.f32 %v225_v51, 0.0  ;;  %v228_v56 = vadd.f32 %v631_v54, %v543_v21  ;;  %v219_v57 = vpop.f32.mrb[11].mxu1 }
  0xfb   :  { %v255_v58 = vmax.f32 %v217_v53, 0.0  ;;  %v220_v59 = vadd.f32 %v543_v21, %v219_v57 }
  0xfc   :  { %v258_v60 = vmax.f32 %v228_v56, 0.0 }
  0xfd   :  { %v256_v61 = vmax.f32 %v220_v59, 0.0 }
  0xfe   :  { %v268_v62 = vpack.c.bf16 %v258_v60, %v257_v55 }
  0xff   :  { %v267_v63 = vpack.c.bf16 %v256_v61, %v255_v58  ;;  %v634_v0 = vpop.f32.mrb[12].mxu1 }
 0x100   :  { %v241_v1 = vadd.f32 %v634_v0, %v543_v21  ;;  %v232_v2 = vpop.f32.mrb[13].mxu1 }
 0x101   :  { %660 = vmatprep.mubr.bf16.mxu1 %v267_v63  ;;  %v233_v3 = vadd.f32 %v543_v21, %v232_v2  ;;  %v635_v4 = vpop.f32.mrb[14].mxu1 }
 0x102   :  { %661 = vmatmul.mubr.bf16.gmra.mrb[24].mxu1 %v268_v62  ;;  %v261_v5 = vmax.f32 %v241_v1, 0.0  ;;  %v244_v6 = vadd.f32 %v635_v4, %v543_v21  ;;  %v235_v7 = vpop.f32.mrb[15].mxu1 }
 0x103   :  { %v259_v8 = vmax.f32 %v233_v3, 0.0  ;;  %v236_v9 = vadd.f32 %v543_v21, %v235_v7 }
 0x104   :  { %v262_v10 = vmax.f32 %v244_v6, 0.0 }
 0x105   :  { %v260_v11 = vmax.f32 %v236_v9, 0.0 }
 0x106   :  { %v270_v12 = vpack.c.bf16 %v262_v10, %v261_v5  ;;  %v713_v10 = vld [vmem:[%s892_s5] sm:$0xff]   ;;  %s718_s5 = scalar_lea.vmem %s536_s1, 16 }
 0x107   :  { %v269_v13 = vpack.c.bf16 %v260_v11, %v259_v8  ;;  %v517_v11 = vlaneseq  ;;  %p719_p0 = scmp.ne.s32.totalorder %s536_s1, %s718_s5  ;;  %p724_p2 = scmp.lt.s32.totalorder %s722_s20, %s718_s5 }
 0x109   :  { %664 = vmatprep.mubr.bf16.mxu1 %v269_v13  ;;  %p725_p3 = por %p724_p2, %p723_p1 }
 0x10a   :  { %665 = vmatmul.mubr.bf16.gmra.mrb[28].mxu1 %v270_v12  ;;  %v518_v12 = vshrl.u32 %v517_v11, 7 }
 0x10b   :  { %p726_p4 = pnand %p725_p3, %p719_p0 }
 0x10c   :  { %v519_v13 = vsub.s32 0, %v518_v12 }
 0x10e   :  { %v520_v16 = vrot.slane %v515_v15, %v519_v13 }
 0x1c5   :  { %v654_v18 = vpop.f32.mrb[16].mxu1 }
 0x1c6   :  { %v385_v19 = vadd.f32 %v654_v18, %v564_v17  ;;  %v376_v20 = vpop.f32.mrb[17].mxu1 }
 0x1c7   :  { %v377_v21 = vadd.f32 %v564_v17, %v376_v20  ;;  %v655_v22 = vpop.f32.mrb[18].mxu1 }
 0x1c8   :  { %v388_v23 = vadd.f32 %v655_v22, %v564_v17  ;;  %v379_v24 = vpop.f32.mrb[19].mxu1  ;;  %v441_v26 = vmax.f32 %v385_v19, 0.0 }
 0x1c9   :  { %v380_v25 = vadd.f32 %v564_v17, %v379_v24  ;;  %v439_v28 = vmax.f32 %v377_v21, 0.0 }
 0x1ca   :  { %v442_v27 = vmax.f32 %v388_v23, 0.0 }
 0x1cb   :  { %v440_v29 = vmax.f32 %v380_v25, 0.0 }
 0x1cc   :  { %v458_v30 = vpack.c.bf16 %v442_v27, %v441_v26 }
 0x1cd   :  { %v658_v31 = vpop.f32.mrb[20].mxu1  ;;  %v457_v32 = vpack.c.bf16 %v440_v29, %v439_v28 }
 0x1ce   :  { %v401_v33 = vadd.f32 %v658_v31, %v564_v17  ;;  %v392_v34 = vpop.f32.mrb[21].mxu1 }
 0x1cf   :  { %v393_v35 = vadd.f32 %v564_v17, %v392_v34  ;;  %669 = vmatpush3.bf16.xpose.msra.mxu0 %v457_v32  ;;  %v659_v36 = vpop.f32.mrb[22].mxu1 }
 0x1d0   :  { %v445_v37 = vmax.f32 %v401_v33, 0.0  ;;  %v404_v38 = vadd.f32 %v659_v36, %v564_v17  ;;  %v395_v39 = vpop.f32.mrb[23].mxu1  ;;  %670 = vmatprep.subr.bf16.mxu0 %v742_v14 }
 0x1d1   :  { %v443_v40 = vmax.f32 %v393_v35, 0.0  ;;  %v396_v41 = vadd.f32 %v564_v17, %v395_v39 }
 0x1d2   :  { %v446_v42 = vmax.f32 %v404_v38, 0.0 }
 0x1d3   :  { %v444_v43 = vmax.f32 %v396_v41, 0.0 }
 0x1d4   :  { %v460_v44 = vpack.c.bf16 %v446_v42, %v445_v37 }
 0x1d5   :  { %v459_v45 = vpack.c.bf16 %v444_v43, %v443_v40  ;;  %v662_v46 = vpop.f32.mrb[24].mxu1 }
 0x1d6   :  { %v417_v47 = vadd.f32 %v662_v46, %v564_v17  ;;  %v408_v48 = vpop.f32.mrb[25].mxu1 }
 0x1d7   :  { %671 = vmatpush3.bf16.xpose.msra.mxu0 %v458_v30  ;;  %v409_v49 = vadd.f32 %v564_v17, %v408_v48  ;;  %v663_v50 = vpop.f32.mrb[26].mxu1 }
 0x1d8   :  { %v449_v51 = vmax.f32 %v417_v47, 0.0  ;;  %672 = vmatprep.subr.bf16.mxu0 %v742_v14  ;;  %v420_v52 = vadd.f32 %v663_v50, %v564_v17  ;;  %v411_v53 = vpop.f32.mrb[27].mxu1 }
 0x1d9   :  { %v447_v54 = vmax.f32 %v409_v49, 0.0  ;;  %v412_v55 = vadd.f32 %v564_v17, %v411_v53 }
 0x1da   :  { %v450_v56 = vmax.f32 %v420_v52, 0.0 }
 0x1db   :  { %v448_v57 = vmax.f32 %v412_v55, 0.0 }
 0x1dc   :  { %v462_v58 = vpack.c.bf16 %v450_v56, %v449_v51 }
 0x1dd   :  { %v461_v59 = vpack.c.bf16 %v448_v57, %v447_v54  ;;  %v666_v60 = vpop.f32.mrb[28].mxu1 }
 0x1de   :  { %v433_v61 = vadd.f32 %v666_v60, %v564_v17  ;;  %v424_v62 = vpop.f32.mrb[29].mxu1 }
 0x1df   :  { %673 = vmatpush3.bf16.xpose.msra.mxu0 %v459_v45  ;;  %v425_v63 = vadd.f32 %v564_v17, %v424_v62  ;;  %v667_v0 = vpop.f32.mrb[30].mxu1 }
 0x1e0   :  { %674 = vmatprep.subr.bf16.mxu0 %v742_v14  ;;  %v453_v1 = vmax.f32 %v433_v61, 0.0  ;;  %v436_v2 = vadd.f32 %v667_v0, %v564_v17  ;;  %v427_v3 = vpop.f32.mrb[31].mxu1 }
 0x1e1   :  { %v451_v4 = vmax.f32 %v425_v63, 0.0  ;;  %v428_v5 = vadd.f32 %v564_v17, %v427_v3 }
 0x1e2   :  { %v454_v6 = vmax.f32 %v436_v2, 0.0 }
 0x1e3   :  { %v452_v7 = vmax.f32 %v428_v5, 0.0 }
 0x1e4   :  { %v464_v8 = vpack.c.bf16 %v454_v6, %v453_v1 }
 0x1e5   :  { %v463_v9 = vpack.c.bf16 %v452_v7, %v451_v4 }
 0x1e7   :  { %675 = vmatpush3.bf16.xpose.msra.mxu0 %v460_v44 }
 0x1e8   :  { %676 = vmatprep.subr.bf16.mxu0 %v742_v14 }
 0x1ef   :  { %677 = vmatpush3.bf16.xpose.msra.mxu0 %v461_v59 }
 0x1f0   :  { %678 = vmatprep.subr.bf16.mxu0 %v742_v14 }
 0x1f7   :  { %679 = vmatpush3.bf16.xpose.msra.mxu0 %v462_v58 }
 0x1f8   :  { %680 = vmatprep.subr.bf16.mxu0 %v742_v14 }
 0x1ff   :  { %681 = vmatpush3.bf16.xpose.msra.mxu0 %v463_v9 }
 0x200   :  { %682 = vmatprep.subr.bf16.mxu0 %v742_v14 }
 0x207   :  { %683 = vmatpush3.bf16.xpose.msra.mxu0 %v464_v8 }
 0x20e   :  { %685 = vmatmul.mubr.bf16.vlgmr.msra.gmra.mrb[0].mxu0 %v713_v10 }
 0x2e1   :  { %v505_v17 = vpop.f32.mrb[0].mxu0 }
 0x2e2   :  { %v521_v18 = vadd.f32 %v520_v16, %v505_v17  ;;  %v686_v19 = vpop.f32.mrb[1].mxu0 }
 0x2e3   :  { %v508_v20 = vpop.f32.mrb[2].mxu0 }
 0x2e4   :  { %v574_v21 = vmul.f32 -1.442695, %v521_v18  ;;  %v687_v22 = vpop.f32.mrb[3].mxu0 }
 0x2e6   :  { %714 = vpow2.f32 %v574_v21 }
 0x2f0   :  { %v715_v23 = vpop.eup %714 }
 0x2f1   :  { %v525_v14 = vadd.f32 1.0, %v715_v23 }
 0x2f3   :  { %716 = vrcp.f32 %v525_v14 }
 0x2fd   :  { %v717_v24 = vpop.eup %716 }
 0x2fe   :  { %528 = vst [vmem:[#allocation3] sm:$0x1] %v717_v24 }
 0x2ff   :  { %729 = shalt.err (!%p726_p4)
}
 0x300   :  { %s730_s23 = scalar_lea.hbm %s894_s7, 16 }
 0x301   :  { %p731_p5 = scmp.ne.s32.totalorder %s894_s7, %s730_s23  ;;  %p734_p6 = scmp.lt.u32.totalorder %s730_s23, %s894_s7 }
 0x303   :  { %p736_p7 = pnand %p734_p6, %p731_p5 }
 0x305   :  { %739 = shalt.err (!%p736_p7)
}
 0x306   :  { %538 = dma.vmem_to_hbm [thread:$0]  %s536_s1, 16, %s894_s7, [#allocation4]  }
 0x307   :  { %740 = dma.done.wait [#allocation4], 16  }
 0x308   :  { %741 = vsyncadd [#allocation4], 4294967280 }
 0x309   :  { %542 = vsyncpa [#allocation4], 1 }

</bundles_post_ra>
